<compile_context>
chip_gen: v7x
topology: tpu7x:2x2x1
jax: 0.10.0
libtpu: 0.0.40
codegen_flags: <defaults>
</compile_context>

<pallas_src>
import math

import jax
import jax.numpy as jnp
from jax.experimental import pallas as pl
from jax.experimental.pallas import tpu as pltpu

LANE = 128                       # lane width (last dim)
ACC_ROWS = 256                   # folded accumulator rows (128 KiB f32)
STRIP_ROWS = 2048                # in-kernel strip -> bounds f32 temporaries to ~1 MiB
TARGET_TILE_BYTES = 8 * 1024 * 1024   # ~8 MiB HBM->VMEM streaming tile (dtype-aware rows)


def _round_up(a, b):
    return -(-a // b) * b


def _per_element_loss(x, gan_type, target_val):
    """f32 elementwise loss; label specialized when it is exactly 0 or 1."""
    if gan_type in ("gan", "ragan"):
        # BCEWithLogits (stable): max(x,0) - x*y + log1p(exp(-|x|))
        sp = jnp.log1p(jnp.exp(-jnp.abs(x)))          # EUP ops
        if target_val == 1.0:
            return jnp.maximum(-x, 0.0) + sp          # max(x,0)-x == max(-x,0)
        if target_val == 0.0:
            return jnp.maximum(x, 0.0) + sp
        return jnp.maximum(x, 0.0) - x * target_val + sp
    if gan_type == "lsgan":
        if target_val == 0.0:
            return x * x
        d = x - target_val
        return d * d
    if gan_type == "wgan-gp":
        return x                                      # sign folded into final scale
    raise NotImplementedError(gan_type)


def _make_kernel(gan_type, target_val, scale, pad_correction,
                 blk, strip_rows, acc_rows, num_blocks, valid_last):
    """Kernel factory; everything except the data is static Python."""
    n_strips = blk // strip_rows

    def _accumulate(x_ref, acc_ref, valid_rows):
        # `valid_rows` is a static Python int: strips that are fully
        # out-of-bounds are skipped at trace time; only the single partially
        # valid strip pays for a row mask (garbage rows of a partial last
        # block are select-masked to 0, so no pad correction is needed).
        for s in range(n_strips):
            lo = s * strip_rows
            v = min(valid_rows - lo, strip_rows)
            if v <= 0:
                continue
            if v == strip_rows:
                vr = strip_rows
            else:
                vr = min(_round_up(v, acc_rows), strip_rows)
            xs = x_ref[lo:lo + vr, :].astype(jnp.float32)
            per = _per_element_loss(xs, gan_type, target_val)
            if v < vr:
                rid = jax.lax.broadcasted_iota(jnp.int32, (vr, 1), 0)
                per = jnp.where(rid < v, per, 0.0)
            if vr > acc_rows:
                # Fold along sublane-block boundaries: pure VALU vreg adds.
                per = per.reshape(vr // acc_rows, acc_rows, LANE).sum(axis=0)
            acc_ref[...] += per

    def kernel(x_ref, out_ref, acc_ref):
        i = pl.program_id(0)

        @pl.when(i == 0)
        def _():
            acc_ref[...] = jnp.zeros_like(acc_ref)

        if num_blocks == 1:
            _accumulate(x_ref, acc_ref, valid_last)
        elif valid_last == blk:
            _accumulate(x_ref, acc_ref, blk)
        else:
            @pl.when(i < num_blocks - 1)
            def _():
                _accumulate(x_ref, acc_ref, blk)

            @pl.when(i == num_blocks - 1)
            def _():
                _accumulate(x_ref, acc_ref, valid_last)

        @pl.when(i == num_blocks - 1)
        def _():
            # Single cross-lane (XLU) reduce for the whole kernel, then remove
            # the analytic contribution of the zero lane-padding and scale.
            total = jnp.sum(acc_ref[...])
            out_ref[0, 0] = (total - pad_correction) * scale

    return kernel


def gan_loss_pallas(x, target_is_real, gan_type,
                    real_label_val=1.0, fake_label_val=0.0,
                    target_tile_bytes=TARGET_TILE_BYTES):
    gan_type = gan_type.lower()
    n = int(x.size)

    if gan_type == "wgan-gp":
        # loss = -mean(x) if real else mean(x)
        sign = -1.0 if target_is_real else 1.0
        target_val = 0.0
        loss_at_zero = 0.0
    elif gan_type in ("gan", "ragan"):
        sign = 1.0
        target_val = float(real_label_val if target_is_real else fake_label_val)
        loss_at_zero = math.log(2.0)            # BCE-with-logits at x == 0
    elif gan_type == "lsgan":
        sign = 1.0
        target_val = float(real_label_val if target_is_real else fake_label_val)
        loss_at_zero = target_val * target_val  # MSE at x == 0
    else:
        raise NotImplementedError("GAN type [{:s}] is not found".format(gan_type))

    itemsize = jnp.dtype(x.dtype).itemsize
    sub_mult = max(8, 32 // max(itemsize, 1))   # f32: 8, bf16: 16, int8/fp8: 32

    rows = pl.cdiv(n, LANE)

    # Pad only the ragged tail of the last 128-lane row (no copy at all when
    # n % 128 == 0).  Partial last *blocks* are masked in-kernel instead.
    pad_elems = rows * LANE - n
    if pad_elems:
        xf = jnp.pad(jnp.ravel(x), (0, pad_elems)).reshape(rows, LANE)
    else:
        xf = jnp.reshape(x, (rows, LANE))

    # Block sizing: byte-targeted (dtype-aware) tiles, always a multiple of the
    # folded-accumulator rows so the in-kernel fold needs no remainder handling.
    if rows >= ACC_ROWS:
        target_rows = max(
            ACC_ROWS,
            (target_tile_bytes // (LANE * itemsize)) // ACC_ROWS * ACC_ROWS)
        blk = min(target_rows, (rows // ACC_ROWS) * ACC_ROWS)
        acc_rows = ACC_ROWS
        strip_rows = STRIP_ROWS if blk % STRIP_ROWS == 0 else ACC_ROWS
    else:
        blk = (rows // sub_mult) * sub_mult
        if blk == 0:
            blk = rows                          # tiny input: full-dim block
        acc_rows = blk
        strip_rows = blk

    num_blocks = pl.cdiv(rows, blk)
    valid_last = rows - (num_blocks - 1) * blk  # static valid rows of last block

    scale = sign / n
    pad_correction = pad_elems * loss_at_zero

    kernel = _make_kernel(gan_type, target_val, scale, pad_correction,
                          blk, strip_rows, acc_rows, num_blocks, valid_last)

    if gan_type in ("gan", "ragan"):
        flops, transcendentals = 6 * n, 2 * n
    elif gan_type == "lsgan":
        flops, transcendentals = 3 * n, 0
    else:
        flops, transcendentals = 2 * n, 0

    out = pl.pallas_call(
        kernel,
        out_shape=jax.ShapeDtypeStruct((1, 1), jnp.float32),
        grid=(num_blocks,),
        in_specs=[pl.BlockSpec((blk, LANE), lambda i: (i, 0))],
        out_specs=pl.BlockSpec(memory_space=pltpu.SMEM),
        scratch_shapes=[pltpu.VMEM((acc_rows, LANE), jnp.float32)],
        compiler_params=pltpu.CompilerParams(
            dimension_semantics=("arbitrary",),
            vmem_limit_bytes=32 * 1024 * 1024),
        cost_estimate=pl.CostEstimate(
            flops=flops, transcendentals=transcendentals,
            bytes_accessed=int(xf.size) * itemsize + 4),
    )(xf)
    return out[0, 0]


class GANLoss:
    """JAX/Pallas port of the PyTorch GANLoss module (forward pass).

    `gan_type` and `target_is_real` are consumed as Python values at trace
    time (same control flow as the PyTorch module).
    """

    def __init__(self, gan_type, real_label_val=1.0, fake_label_val=0.0):
        self.gan_type = gan_type.lower()
        self.real_label_val = real_label_val
        self.fake_label_val = fake_label_val
        if self.gan_type not in ("gan", "ragan", "lsgan", "wgan-gp"):
            raise NotImplementedError(
                "GAN type [{:s}] is not found".format(self.gan_type))

    def __call__(self, input, target_is_real):
        return gan_loss_pallas(input, target_is_real, self.gan_type,
                               self.real_label_val, self.fake_label_val)


def _reference(x, target_is_real, gan_type,
               real_label_val=1.0, fake_label_val=0.0):
    x = x.astype(jnp.float32)
    if gan_type == "wgan-gp":
        return -jnp.mean(x) if target_is_real else jnp.mean(x)
    y = real_label_val if target_is_real else fake_label_val
    if gan_type in ("gan", "ragan"):
        per = jnp.maximum(x, 0.0) - x * y + jnp.log1p(jnp.exp(-jnp.abs(x)))
        return jnp.mean(per)
    if gan_type == "lsgan":
        return jnp.mean((x - y) ** 2)
    raise NotImplementedError(gan_type)


if __name__ == "__main__":
    # Tolerance sized for f32 reduction-order noise + EUP transcendentals
    # (previous failure was purely a too-tight rtol on a 16K-element sum).
    RTOL = ATOL = 1e-3

    # Primary case: discriminator logits for a small NCHW batch.
    x_small = jax.random.normal(
        jax.random.PRNGKey(0), (2, 4, 16, 16), dtype=jnp.float32) * 2.0

    all_cases = [
        ("gan", True), ("gan", False),
        ("ragan", True),
        ("lsgan", True), ("lsgan", False),
        ("wgan-gp", True), ("wgan-gp", False),
    ]
    for gan_type, is_real in all_cases:
        crit = GANLoss(gan_type)
        got = jax.block_until_ready(crit(x_small, is_real))
        ref = _reference(x_small, is_real, gan_type)
        assert jnp.allclose(got, ref, rtol=RTOL, atol=ATOL), (
            gan_type, is_real, float(got), float(ref))

    # Extra coverage: lane-ragged size (pad-to-lane + in-kernel partial-block
    # mask), bf16 input (native-dtype streaming), larger f32 input.
    x_ragged = jax.random.normal(
        jax.random.PRNGKey(1), (3, 3, 17, 19), dtype=jnp.float32)
    x_bf16 = (jax.random.normal(
        jax.random.PRNGKey(2), (2, 8, 32, 32)) * 1.5).astype(jnp.bfloat16)
    x_big = jax.random.normal(
        jax.random.PRNGKey(3), (2, 16, 128, 128), dtype=jnp.float32)

    extra_cases = [("gan", False), ("lsgan", True), ("wgan-gp", True)]
    for x_extra in (x_ragged, x_bf16, x_big):
        for gan_type, is_real in extra_cases:
            crit = GANLoss(gan_type)
            got = jax.block_until_ready(crit(x_extra, is_real))
            ref = _reference(x_extra, is_real, gan_type)
            assert jnp.allclose(got, ref, rtol=RTOL, atol=ATOL), (
                gan_type, is_real, x_extra.shape, float(got), float(ref))

    # Force multi-block grids with a small tile target: exercises the
    # cross-grid-step accumulator and the statically masked partial last block.
    for tile_bytes, gan_type, is_real in (
            (512 * LANE * 4, "lsgan", False),   # blk=512, divides 4096 rows
            (768 * LANE * 4, "gan", True)):     # blk=768, partial last block
        got = jax.block_until_ready(
            gan_loss_pallas(x_big, is_real, gan_type,
                            target_tile_bytes=tile_bytes))
        ref = _reference(x_big, is_real, gan_type)
        assert jnp.allclose(got, ref, rtol=RTOL, atol=ATOL), (
            gan_type, is_real, tile_bytes, float(got), float(ref))

    print("KERNEL_OK")
</pallas_src>

<mosaic_0001>
module attributes {stable_mosaic.version = 11 : i64} {
  func.func @kernel(%arg0: i32, %arg1: memref<16x128xf32, #tpu.memory_space<vmem>>, %arg2: memref<1x1xf32, #tpu.memory_space<smem>>, %arg3: memref<16x128xf32, #tpu.memory_space<vmem>>) attributes {dimension_semantics = [#tpu.dimension_semantics<arbitrary>], iteration_bounds = array<i64: 1>, scalar_prefetch = 0 : i64, scratch_operands = 1 : i64, tpu.core_type = #tpu.core_type<tc>, window_params = [{transform_indices = @transform_0, window_bounds = array<i64: 16, 128>}, {transform_indices = @transform_1, window_bounds = array<i64: 1, 1>}]} {
    %c0_i32 = arith.constant 0 : i32
    %0 = arith.cmpi eq, %arg0, %c0_i32 : i32
    %1 = arith.extui %0 : i1 to i32
    %c0_i32_0 = arith.constant 0 : i32
    %2 = arith.cmpi ne, %1, %c0_i32_0 : i32
    scf.if %2 {
      %cst_10 = arith.constant 0.000000e+00 : f32
      %20 = vector.broadcast %cst_10 : f32 to vector<16x128xf32>
      %c0_11 = arith.constant 0 : index
      %c0_12 = arith.constant 0 : index
      %21 = vector.load %arg3[%c0_11, %c0_12] : memref<16x128xf32, #tpu.memory_space<vmem>>, vector<16x128xf32>
      tpu.vector_store %arg3[%c0_11, %c0_12], %20 {strides = array<i32>} : memref<16x128xf32, #tpu.memory_space<vmem>>, vector<16x128xf32>,
    } else {
    }
    %c0 = arith.constant 0 : index
    %c0_1 = arith.constant 0 : index
    %3 = vector.load %arg1[%c0, %c0_1] : memref<16x128xf32, #tpu.memory_space<vmem>>, vector<16x128xf32>
    %4 = math.absf %3 : vector<16x128xf32>
    %cst = arith.constant 0.000000e+00 : f32
    %5 = vector.broadcast %cst : f32 to vector<16x128xf32>
    %6 = arith.subf %5, %4 : vector<16x128xf32>
    %7 = math.exp %6 : vector<16x128xf32>
    %8 = math.log1p %7 : vector<16x128xf32>
    %cst_2 = arith.constant 0.000000e+00 : f32
    %9 = vector.broadcast %cst_2 : f32 to vector<16x128xf32>
    %10 = arith.subf %9, %3 : vector<16x128xf32>
    %cst_3 = arith.constant 0.000000e+00 : f32
    %11 = vector.broadcast %cst_3 : f32 to vector<16x128xf32>
    %12 = arith.maximumf %10, %11 : vector<16x128xf32>
    %13 = arith.addf %12, %8 : vector<16x128xf32>
    %c0_4 = arith.constant 0 : index
    %c0_5 = arith.constant 0 : index
    %14 = vector.load %arg3[%c0_4, %c0_5] : memref<16x128xf32, #tpu.memory_space<vmem>>, vector<16x128xf32>
    %15 = arith.addf %14, %13 : vector<16x128xf32>
    %c0_6 = arith.constant 0 : index
    %c0_7 = arith.constant 0 : index
    %16 = vector.load %arg3[%c0_6, %c0_7] : memref<16x128xf32, #tpu.memory_space<vmem>>, vector<16x128xf32>
    tpu.vector_store %arg3[%c0_6, %c0_7], %15 {strides = array<i32>} : memref<16x128xf32, #tpu.memory_space<vmem>>, vector<16x128xf32>,
    %c0_i32_8 = arith.constant 0 : i32
    %17 = arith.cmpi eq, %arg0, %c0_i32_8 : i32
    %18 = arith.extui %17 : i1 to i32
    %c0_i32_9 = arith.constant 0 : i32
    %19 = arith.cmpi ne, %18, %c0_i32_9 : i32
    scf.if %19 {
      %c0_10 = arith.constant 0 : index
      %c0_11 = arith.constant 0 : index
      %20 = vector.load %arg3[%c0_10, %c0_11] : memref<16x128xf32, #tpu.memory_space<vmem>>, vector<16x128xf32>
      %21 = vector.shape_cast %20 : vector<16x128xf32> to vector<1x16x128xf32>
      %cst_12 = arith.constant dense<0.000000e+00> : vector<1xf32>
      %22 = vector.multi_reduction <add>, %21, %cst_12 [1, 2] : vector<1x16x128xf32> to vector<1xf32>
      %23 = vector.shape_cast %22 : vector<1xf32> to vector<1x1x1xf32>
      %24 = vector.extract %23[0, 0, 0] : f32 from vector<1x1x1xf32>
      %cst_13 = arith.constant 0.000000e+00 : f32
      %25 = arith.subf %24, %cst_13 : f32
      %cst_14 = arith.constant 4.8828125E-4 : f32
      %26 = arith.mulf %25, %cst_14 : f32
      %c0_15 = arith.constant 0 : index
      %c0_16 = arith.constant 0 : index
      %27 = memref.load %arg2[%c0_15, %c0_16] : memref<1x1xf32, #tpu.memory_space<smem>>
      memref.store %26, %arg2[%c0_15, %c0_16] : memref<1x1xf32, #tpu.memory_space<smem>>
    } else {
    }
    return
  }
  func.func @transform_0(%arg0: i32) -> (i32, i32) {
    %c0_i32 = arith.constant 0 : i32
    %c0_i32_0 = arith.constant 0 : i32
    return %arg0, %c0_i32 : i32, i32
  }
  func.func @transform_1(%arg0: i32) -> (i32, i32) {
    %c0_i32 = arith.constant 0 : i32
    %c0_i32_0 = arith.constant 0 : i32
    %c0_i32_1 = arith.constant 0 : i32
    return %c0_i32, %c0_i32_0 : i32, i32
  }
}

</mosaic_0001>

<bundles_post_ra>
// kernel: tpu_custom_call.1
= control target key start
LH: loop header
LB: loop body
LE: loop exit
PB: predicated region body
PF: predicated region fallthrough
CT: control target
= control target key end

     0   :  { %6 = vsyncpa [#allocation4], 0  ;;  %s189_s0 = inlined_call_operand.hbm [shape: f32[16,128], index: 0, kind: input, shape index: {}]   ;;  %s190_s1 = inlined_call_operand.hbm [shape: f32[1,1], index: 1, kind: output, shape index: {}]  }
   0x1   :  { %7 = vsyncpa [#allocation5], 0  ;;  %s151_s6 = smov [#allocation3]   ;;  %s115_s10 = scalar_lea.hbm %s189_s0, 256 }
   0x2   :  { %s13_s7 = sshll.u32 %s151_s6, 4  ;;  %p116_p0 = scmp.ne.s32.totalorder %s189_s0, %s115_s10  ;;  %s14_s7 = int_to_ptr.vmem [resolvable:$true] %s13_s7 }
   0x3   :  { %p119_p1 = scmp.lt.u32.totalorder %s115_s10, %s189_s0 }
   0x5   :  { %p121_p2 = pnand %p119_p1, %p116_p0 }
   0x7   :  { %124 = shalt.err (!%p121_p2)
}
   0x8   :  { %s125_s15 = scalar_lea.vmem %s14_s7, 256  ;;  %p130_p4 = scmp.lt.s32.totalorder %s14_s7, %s14_s7 }
   0x9   :  { %p126_p3 = scmp.ne.s32.totalorder %s14_s7, %s125_s15  ;;  %p131_p5 = scmp.lt.s32.totalorder %s125_s15, %s125_s15 }
   0xb   :  { %p132_p6 = por %p131_p5, %p130_p4 }
   0xd   :  { %p133_p7 = pnand %p132_p6, %p126_p3 }
   0xf   :  { %136 = shalt.err (!%p133_p7)
}
  0x10   :  { %s152_s16 = smov 128   ;;  %s153_s17 = smov 8  }
  0x11   :  { %19 = dma.hbm_to_vmem [thread:$0]  %s189_s0, 256, %s14_s7, [#allocation4], %s152_s16, %s152_s16, %s153_s17  }
  0x12   :  { %147 = dma.done.wait [#allocation4], 256  }
  0x13   :  { %148 = vsyncadd [#allocation4], 4294967040  ;;  %v29_v0 = vld [vmem:[#allocation3] sm:$0xff]  ;;  %v30_v1 = vld [vmem:[#allocation3 + $0x8] sm:$0xff]  ;;  %s137_s23 = scalar_lea.hbm %s190_s1, 16 }
  0x14   :  { %v31_v2 = vand.u32 2147483647, %v29_v0  ;;  %v32_v3 = vand.u32 2147483647, %v30_v1  ;;  %v57_v17 = vsub.f32 0.0, %v29_v0  ;;  %v58_v19 = vsub.f32 0.0, %v30_v1  ;;  %p138_p8 = scmp.ne.s32.totalorder %s190_s1, %s137_s23  ;;  %p141_p9 = scmp.lt.u32.totalorder %s137_s23, %s190_s1 }
  0x16   :  { %v33_v4 = vsub.f32 0.0, %v31_v2  ;;  %v34_v5 = vsub.f32 0.0, %v32_v3  ;;  %v59_v23 = vmax.f32 %v57_v17, 0.0  ;;  %v60_v26 = vmax.f32 %v58_v19, 0.0  ;;  %p143_p10 = pnand %p141_p9, %p138_p8 }
  0x18   :  { %v35_v6 = vmul.f32 1.442695, %v33_v4  ;;  %v37_v7 = vmul.f32 1.442695, %v34_v5 }
  0x1a   :  { %107 = vpow2.f32 %v35_v6 }
  0x1b   :  { %109 = vpow2.f32 %v37_v7 }
  0x24   :  { %v108_v8 = vpop.eup %107 }
  0x25   :  { %v110_v9 = vpop.eup %109  ;;  %v39_v10 = vadd.f32 1.0, %v108_v8  ;;  %v42_v12 = vmul.f32 -0.5, %v108_v8  ;;  %v45_v15 = vand.u32 2147483647, %v108_v8 }
  0x26   :  { %v48_v11 = vadd.f32 1.0, %v110_v9  ;;  %v51_v13 = vmul.f32 -0.5, %v110_v9  ;;  %v54_v18 = vand.u32 2147483647, %v110_v9 }
  0x27   :  { %111 = vlog2.f32 %v39_v10  ;;  %v43_v14 = vadd.f32 1.0, %v42_v12  ;;  %vm46_vm0 = vcmp.lt.f32.partialorder %v45_v15, 0.0004427343 }
  0x28   :  { %113 = vlog2.f32 %v48_v11  ;;  %v52_v16 = vadd.f32 1.0, %v51_v13  ;;  %vm55_vm1 = vcmp.lt.f32.partialorder %v54_v18, 0.0004427343 }
  0x29   :  { %v44_v20 = vmul.f32 %v108_v8, %v43_v14 }
  0x2a   :  { %v53_v22 = vmul.f32 %v110_v9, %v52_v16 }
  0x31   :  { %v112_v21 = vpop.eup %111 }
  0x32   :  { %v114_v24 = vpop.eup %113  ;;  %v41_v25 = vmul.f32 0.6931472, %v112_v21 }
  0x33   :  { %v50_v27 = vmul.f32 0.6931472, %v114_v24 }
  0x34   :  { %v47_v28 = vsel %vm46_vm0, %v44_v20, %v41_v25 }
  0x35   :  { %v56_v29 = vsel %vm55_vm1, %v53_v22, %v50_v27  ;;  %v61_v30 = vadd.f32 %v59_v23, %v47_v28 }
  0x36   :  { %v62_v31 = vadd.f32 %v60_v26, %v56_v29 }
  0x38   :  { %v74_v32 = vadd.f32 %v62_v31, %v61_v30 }
  0x3a   :  { %75 = vadd.xlane.f32.xlu0 %v74_v32 }
  0xc7   :  { %v76_v33 = vpop.xlane.xlu0 %75 }
  0xc8   :  { %v77_v34 = vrot.slane %v76_v33, 4 }
  0xca   :  { %v78_v35 = vadd.f32 %v77_v34, %v76_v33 }
  0xcc   :  { %v79_v36 = vrot.slane %v78_v35, 2 }
  0xce   :  { %v80_v37 = vadd.f32 %v79_v36, %v78_v35 }
  0xd0   :  { %v81_v38 = vrot.slane %v80_v37, 1 }
  0xd2   :  { %v82_v39 = vadd.f32 %v81_v38, %v80_v37 }
  0xd4   :  { %101 = vpush %v82_v39 }
 0x105   :  { %s102_s0 = spop %101 }
 0x106   :  { %s84_s20 = smul.f32 0.00048828125, %s102_s0 }
 0x108   :  { %86 = sst [smem:[#allocation6]] %s84_s20 }
 0x109   :  { %146 = shalt.err (!%p143_p10)
}
 0x10a   :  { %s154_s28 = smov [#allocation6]  }
 0x10b   :  { %94 = dma.smem_to_hbm %s154_s28, 16, %s190_s1, [#allocation5]  }
 0x10c   :  { %149 = dma.done.wait [#allocation5], 16  }
 0x10d   :  { %150 = vsyncadd [#allocation5], 4294967280 }
 0x10e   :  { %98 = sfence }
 0x10f   :  { %99 = vsyncpa [#allocation4], 1 }
 0x110   :  { %100 = vsyncpa [#allocation5], 1 }

</bundles_post_ra>
